<compile_context>
chip_gen: v5e
topology: v5e:2x2
jax: 0.10.0
libtpu: 0.0.40
codegen_flags: <defaults>
</compile_context>

<pallas_src>
import jax
import jax.numpy as jnp
from jax.experimental import pallas as pl
from jax.experimental.pallas import tpu as pltpu

NUM_CLASSES = 7
HID = 16

# Param slab layout (row offsets 8-sublane aligned, cols padded to HID=16):
#   rows  0: 3   w1t  [3,16]    GCNConv1 weight, pre-transposed to [in, out]
#   row   8      b1   [1,16]
#   rows 16:32   w2t  [16,16]
#   row  32      b2   [1,16]
#   rows 40:56   wlt  [16,16]   Linear weight (cols 7..15 zero-padded)
#   row  56      bl   [1,16]    (cols 7..15 zero-padded)
SLAB_ROWS = 64


def gnn_kernel(x_ref, a_ref, slab_ref, out_ref):
    x = x_ref[...]            # [N, 3]
    a = a_ref[...]            # [N, N] normalized adjacency (with self loops)
    slab = slab_ref[...]      # [64, 16] packed parameters

    w1t = slab[0:3, :]        # [3, 16]
    b1 = slab[8:9, :]         # [1, 16]
    w2t = slab[16:32, :]      # [16, 16]
    b2 = slab[32:33, :]       # [1, 16]
    wlt = slab[40:56, :]      # [16, 16], cols >= 7 are zero
    bl = slab[56:57, :]       # [1, 16],  cols >= 7 are zero

    # ---- GCNConv(3 -> 16) + ReLU:  (A @ X) @ W1  keeps the intermediate [N,3]
    ax = jnp.dot(a, x, preferred_element_type=jnp.float32)            # [N, 3]
    h = jnp.dot(ax, w1t, preferred_element_type=jnp.float32) + b1     # [N, 16]
    h = jnp.maximum(h, 0.0)

    # ---- GCNConv(16 -> 16) + ReLU
    ah = jnp.dot(a, h, preferred_element_type=jnp.float32)            # [N, 16]
    h = jnp.dot(ah, w2t, preferred_element_type=jnp.float32) + b2     # [N, 16]
    h = jnp.maximum(h, 0.0)

    # ---- head: per-node logits first, then pool (sum) -- same math as
    #      pool-then-Linear since the layer is affine and bias added once.
    ln = jnp.dot(h, wlt, preferred_element_type=jnp.float32)          # [N, 16]
    logits = jnp.sum(ln, axis=0, keepdims=True) + bl                  # [1, 16]
    logits = logits[:, 0:NUM_CLASSES]   # drop zero-padded lanes BEFORE softmax

    # ---- log_softmax(dim=1), max-stabilized
    m = jnp.max(logits, axis=1, keepdims=True)
    lse = m + jnp.log(jnp.sum(jnp.exp(logits - m), axis=1, keepdims=True))
    out_ref[...] = logits - lse


def gcn_normalized_adjacency(edge_index, num_nodes):
    """A_hat = D^{-1/2} (A + I) D^{-1/2}, A[i,j] != 0 iff edge j -> i."""
    src = edge_index[0]
    dst = edge_index[1]
    a = jnp.zeros((num_nodes, num_nodes), jnp.float32)
    a = a.at[dst, src].add(1.0)
    a = a + jnp.eye(num_nodes, dtype=jnp.float32)
    deg = jnp.sum(a, axis=1)
    d_inv_sqrt = jnp.where(deg > 0, 1.0 / jnp.sqrt(deg), 0.0)
    return d_inv_sqrt[:, None] * a * d_inv_sqrt[None, :]


def build_param_slab(params):
    """One-time packing: transpose / cast / pad all weights into one slab."""
    w1, b1, w2, b2, wl, bl = params
    slab = jnp.zeros((SLAB_ROWS, HID), jnp.float32)
    slab = slab.at[0:3, :].set(w1.T.astype(jnp.float32))
    slab = slab.at[8, :].set(b1.astype(jnp.float32))
    slab = slab.at[16:32, :].set(w2.T.astype(jnp.float32))
    slab = slab.at[32, :].set(b2.astype(jnp.float32))
    slab = slab.at[40:56, 0:NUM_CLASSES].set(wl.T.astype(jnp.float32))
    slab = slab.at[56, 0:NUM_CLASSES].set(bl.astype(jnp.float32))
    return slab


@jax.jit
def gnn_forward(x, edge_index, slab):
    num_nodes = x.shape[0]
    a_hat = gcn_normalized_adjacency(edge_index, num_nodes)
    vmem = pl.BlockSpec(memory_space=pltpu.MemorySpace.VMEM)
    return pl.pallas_call(
        gnn_kernel,
        out_shape=jax.ShapeDtypeStruct((1, NUM_CLASSES), jnp.float32),
        in_specs=[vmem, vmem, vmem],
        out_specs=vmem,
    )(x.astype(jnp.float32), a_hat, slab)


def init_params(key):
    k1, k2, k3, k4, k5, k6 = jax.random.split(key, 6)
    # GCNConv(3, 16): weight [out, in], bias [out]
    w1 = jax.random.normal(k1, (16, 3), jnp.float32) * 0.5
    b1 = jax.random.normal(k2, (16,), jnp.float32) * 0.1
    # GCNConv(16, 16)
    w2 = jax.random.normal(k3, (16, 16), jnp.float32) * 0.25
    b2 = jax.random.normal(k4, (16,), jnp.float32) * 0.1
    # Linear(16, 7)
    wl = jax.random.normal(k5, (7, 16), jnp.float32) * 0.25
    bl = jax.random.normal(k6, (7,), jnp.float32) * 0.1
    return w1, b1, w2, b2, wl, bl


if __name__ == "__main__":
    key = jax.random.PRNGKey(0)
    kx, kp = jax.random.split(key)

    # graph from the test: 8 nodes, undirected path 0-1-2-3-4-5-6-7
    edge_index = jnp.array(
        [[0, 1, 1, 2, 2, 3, 3, 4, 4, 5, 5, 6, 6, 7],
         [1, 0, 2, 1, 3, 2, 4, 3, 5, 4, 6, 5, 7, 6]], dtype=jnp.int32)
    num_nodes = 8
    x = jax.random.normal(kx, (num_nodes, 3), jnp.float32)

    params = init_params(kp)
    slab = jax.block_until_ready(build_param_slab(params))   # one-time cost

    out = gnn_forward(x, edge_index, slab)
    out = jax.block_until_ready(out)

    # reference check in plain JAX (same math as the PyTorch module)
    w1, b1, w2, b2, wl, bl = params
    a_hat = gcn_normalized_adjacency(edge_index, num_nodes)
    h = jnp.maximum(a_hat @ (x @ w1.T) + b1, 0.0)
    h = jnp.maximum(a_hat @ (h @ w2.T) + b2, 0.0)
    pooled = jnp.sum(h, axis=0, keepdims=True)
    logits = pooled @ wl.T + bl
    ref = logits - jax.scipy.special.logsumexp(logits, axis=1, keepdims=True)

    assert out.shape == (1, NUM_CLASSES)
    assert jnp.allclose(out, ref, atol=1e-5, rtol=1e-5)

    print("KERNEL_OK")
</pallas_src>

<mosaic_0001>
module attributes {stable_mosaic.version = 11 : i64} {
  func.func @gnn_kernel(%arg0: memref<8x3xf32, #tpu.memory_space<vmem>>, %arg1: memref<8x8xf32, #tpu.memory_space<vmem>>, %arg2: memref<64x16xf32, #tpu.memory_space<vmem>>, %arg3: memref<1x7xf32, #tpu.memory_space<vmem>>) attributes {dimension_semantics = [], scalar_prefetch = 0 : i64, scratch_operands = 0 : i64, tpu.core_type = #tpu.core_type<tc>} {
    %c0 = arith.constant 0 : index
    %c0_0 = arith.constant 0 : index
    %0 = vector.load %arg0[%c0, %c0_0] : memref<8x3xf32, #tpu.memory_space<vmem>>, vector<8x3xf32>
    %c0_1 = arith.constant 0 : index
    %c0_2 = arith.constant 0 : index
    %1 = vector.load %arg1[%c0_1, %c0_2] : memref<8x8xf32, #tpu.memory_space<vmem>>, vector<8x8xf32>
    %c0_3 = arith.constant 0 : index
    %c0_4 = arith.constant 0 : index
    %2 = vector.load %arg2[%c0_3, %c0_4] : memref<64x16xf32, #tpu.memory_space<vmem>>, vector<64x16xf32>
    %3 = vector.extract_strided_slice %2 {offsets = [0, 0], sizes = [3, 16], strides = [1, 1]} : vector<64x16xf32> to vector<3x16xf32>
    %4 = vector.extract_strided_slice %2 {offsets = [8, 0], sizes = [1, 16], strides = [1, 1]} : vector<64x16xf32> to vector<1x16xf32>
    %5 = vector.extract_strided_slice %2 {offsets = [16, 0], sizes = [16, 16], strides = [1, 1]} : vector<64x16xf32> to vector<16x16xf32>
    %6 = vector.extract_strided_slice %2 {offsets = [32, 0], sizes = [1, 16], strides = [1, 1]} : vector<64x16xf32> to vector<1x16xf32>
    %7 = vector.extract_strided_slice %2 {offsets = [40, 0], sizes = [16, 16], strides = [1, 1]} : vector<64x16xf32> to vector<16x16xf32>
    %8 = vector.extract_strided_slice %2 {offsets = [56, 0], sizes = [1, 16], strides = [1, 1]} : vector<64x16xf32> to vector<1x16xf32>
    %cst = arith.constant dense<0.000000e+00> : vector<8x3xf32>
    %9 = tpu.matmul %1, %0, %cst {dimension_numbers = #tpu.dot_dimension_numbers<[1], [0], [0], [1], [0, 0, 1, 1], [], []>} : vector<8x8xf32>, vector<8x3xf32>, vector<8x3xf32> -> vector<8x3xf32>
    %cst_5 = arith.constant dense<0.000000e+00> : vector<8x16xf32>
    %10 = tpu.matmul %9, %3, %cst_5 {dimension_numbers = #tpu.dot_dimension_numbers<[1], [0], [0], [1], [0, 0, 1, 1], [], []>} : vector<8x3xf32>, vector<3x16xf32>, vector<8x16xf32> -> vector<8x16xf32>
    %11 = vector.broadcast %4 : vector<1x16xf32> to vector<8x16xf32>
    %12 = arith.addf %10, %11 : vector<8x16xf32>
    %cst_6 = arith.constant 0.000000e+00 : f32
    %13 = vector.broadcast %cst_6 : f32 to vector<8x16xf32>
    %14 = arith.maximumf %12, %13 : vector<8x16xf32>
    %cst_7 = arith.constant dense<0.000000e+00> : vector<8x16xf32>
    %15 = tpu.matmul %1, %14, %cst_7 {dimension_numbers = #tpu.dot_dimension_numbers<[1], [0], [0], [1], [0, 0, 1, 1], [], []>} : vector<8x8xf32>, vector<8x16xf32>, vector<8x16xf32> -> vector<8x16xf32>
    %cst_8 = arith.constant dense<0.000000e+00> : vector<8x16xf32>
    %16 = tpu.matmul %15, %5, %cst_8 {dimension_numbers = #tpu.dot_dimension_numbers<[1], [0], [0], [1], [0, 0, 1, 1], [], []>} : vector<8x16xf32>, vector<16x16xf32>, vector<8x16xf32> -> vector<8x16xf32>
    %17 = vector.broadcast %6 : vector<1x16xf32> to vector<8x16xf32>
    %18 = arith.addf %16, %17 : vector<8x16xf32>
    %cst_9 = arith.constant 0.000000e+00 : f32
    %19 = vector.broadcast %cst_9 : f32 to vector<8x16xf32>
    %20 = arith.maximumf %18, %19 : vector<8x16xf32>
    %cst_10 = arith.constant dense<0.000000e+00> : vector<8x16xf32>
    %21 = tpu.matmul %20, %7, %cst_10 {dimension_numbers = #tpu.dot_dimension_numbers<[1], [0], [0], [1], [0, 0, 1, 1], [], []>} : vector<8x16xf32>, vector<16x16xf32>, vector<8x16xf32> -> vector<8x16xf32>
    %cst_11 = arith.constant dense<0.000000e+00> : vector<16xf32>
    %22 = vector.multi_reduction <add>, %21, %cst_11 [0] : vector<8x16xf32> to vector<16xf32>
    %23 = vector.shape_cast %22 : vector<16xf32> to vector<1x16xf32>
    %24 = arith.addf %23, %8 : vector<1x16xf32>
    %25 = vector.extract_strided_slice %24 {offsets = [0, 0], sizes = [1, 7], strides = [1, 1]} : vector<1x16xf32> to vector<1x7xf32>
    %cst_12 = arith.constant dense<0xFF800000> : vector<1xf32>
    %26 = vector.multi_reduction <maximumf>, %25, %cst_12 [1] : vector<1x7xf32> to vector<1xf32>
    %27 = vector.shape_cast %26 : vector<1xf32> to vector<1x1xf32>
    %28 = vector.broadcast %27 : vector<1x1xf32> to vector<1x7xf32>
    %29 = arith.subf %25, %28 : vector<1x7xf32>
    %30 = math.exp %29 : vector<1x7xf32>
    %cst_13 = arith.constant dense<0.000000e+00> : vector<1xf32>
    %31 = vector.multi_reduction <add>, %30, %cst_13 [1] : vector<1x7xf32> to vector<1xf32>
    %32 = vector.shape_cast %31 : vector<1xf32> to vector<1x1xf32>
    %33 = math.log %32 : vector<1x1xf32>
    %34 = arith.addf %27, %33 : vector<1x1xf32>
    %35 = vector.broadcast %34 : vector<1x1xf32> to vector<1x7xf32>
    %36 = arith.subf %25, %35 : vector<1x7xf32>
    %c0_14 = arith.constant 0 : index
    %c0_15 = arith.constant 0 : index
    %37 = vector.load %arg3[%c0_14, %c0_15] : memref<1x7xf32, #tpu.memory_space<vmem>>, vector<1x7xf32>
    tpu.vector_store %arg3[%c0_14, %c0_15], %36 {strides = array<i32>} : memref<1x7xf32, #tpu.memory_space<vmem>>, vector<1x7xf32>,
    return
  }
}

</mosaic_0001>

<bundles_post_ra>
// kernel: gnn_forward.1
= control target key start
LH: loop header
LB: loop body
LE: loop exit
PB: predicated region body
PF: predicated region fallthrough
CT: control target
= control target key end

     0   :  { %vm25_vm0 = vcmask 64512   ;;  %s283_s0 = inlined_call_operand.vmem [shape: f32[8,3], index: 0, kind: input, shape index: {}]   ;;  %s284_s1 = inlined_call_operand.vmem [shape: f32[8,8], index: 1, kind: input, shape index: {}]   ;;  %s285_s2 = inlined_call_operand.vmem [shape: f32[64,16], index: 2, kind: input, shape index: {}]   ;;  %s286_s3 = inlined_call_operand.hbm [shape: f32[1,7], index: 3, kind: output, shape index: {}]  }
   0x1   :  { %v15_v0 = vld [vmem:[%s283_s0] sm:$0xff] }
   0x2   :  { %v16_v1 = vld [vmem:[%s284_s1] sm:$0xff] }
   0x3   :  { %8 = vsyncpa [#allocation3], 0  ;;  %44 = vmatpush.msra.mxu0 %v15_v0  ;;  %v17_v2 = vld [vmem:[%s285_s2] sm:$0xff]  ;;  %vm54_vm1 = vcmask 1042432   ;;  %vm50_vm2 = vcmask 23552   ;;  %v20_v4 = vld [vmem:[%s285_s2 + $0x18] sm:$0xff] }
   0x4   :  { %187 = vmatmul.msk.f32.vlgmr.msra.gmra.mxu0 %vm25_vm0, %v16_v1  ;;  %188 = vmatpush.msk.msra.mxu1 %vm54_vm1, %v17_v2  ;;  %v18_v5 = vld [vmem:[%s285_s2 + $0x8] sm:$0xff]  ;;  %v19_v10 = vld [vmem:[%s285_s2 + $0x10] sm:$0xff]  ;;  %vm100_vm3 = vcmask 130048   ;;  %v21_v14 = vld [vmem:[%s285_s2 + $0x20] sm:$0xff]  ;;  %vm156_vm4 = vcmask 49152   ;;  %s224_s30 = smov [#allocation2]  }
   0x5   :  { %118 = vmatpush.msra.mxu3 %v20_v4  ;;  %v49_v6 = vperm.slane %v18_v5, 0  ;;  %v23_v11 = vld [vmem:[%s285_s2 + $0x30] sm:$0xff]  ;;  %v22_v13 = vld [vmem:[%s285_s2 + $0x28] sm:$0xff]  ;;  %v99_v15 = vperm.slane %v21_v14, 0  ;;  %v24_v26 = vld [vmem:[%s285_s2 + $0x38] sm:$0xff]  ;;  %s176_s2 = sshll.u32 %s224_s30, 4  ;;  %s177_s2 = int_to_ptr.vmem [resolvable:$true] %s176_s2 }
   0x6   :  { %142 = vmatpush.msrb.mxu0 %v23_v11  ;;  %s178_s6 = sshll.u32 %s286_s3, 4  ;;  %s179_s6 = int_to_ptr.hbm [resolvable:$true] %s178_s6 }
   0x7   :  { %119 = vmatpush.msra.mxu3 %v19_v10 }
   0x8   :  { %143 = vmatpush.msrb.mxu0 %v22_v13 }
  0x81   :  { %v46_v3 = vpop.f32.mrf.mxu0 }
  0x82   :  { %189 = vmatmul.msk.f32.vlgmr.msra.gmra.mxu1 %vm50_vm2, %v46_v3 }
  0xff   :  { %v75_v7 = vpop.f32.mrf.mxu1 }
 0x100   :  { %v76_v8 = vadd.f32 %v75_v7, %v49_v6 }
 0x102   :  { %v78_v9 = vmax.f32 %v76_v8, 0.0 }
 0x104   :  { %94 = vmatpush.msra.mxu2 %v78_v9 }
 0x105   :  { %190 = vmatmul.msk.f32.vlgmr.msra.gmra.mxu2 %vm25_vm0, %v16_v1 }
 0x188   :  { %v96_v12 = vpop.f32.mrf.mxu2 }
 0x189   :  { %191 = vmatmul.msk.f32.vlgmr.msra.gmra.mxu3 %vm100_vm3, %v96_v12 }
 0x20c   :  { %v121_v16 = vpop.f32.mrf.mxu3 }
 0x20d   :  { %v122_v17 = vadd.f32 %v121_v16, %v99_v15 }
 0x20f   :  { %v124_v18 = vmax.f32 %v122_v17, 0.0 }
 0x211   :  { %192 = vmatmul.msk.f32.vlgmr.msrb.gmra.mxu0 %vm100_vm3, %v124_v18 }
 0x28e   :  { %v145_v19 = vpop.f32.mrf.mxu0 }
 0x28f   :  { %v148_v20 = vsel %vm100_vm3, %v145_v19, 0.0 }
 0x290   :  { %v149_v21 = vrot.slane %v148_v20, 4 }
 0x292   :  { %v150_v22 = vadd.f32 %v149_v21, %v148_v20 }
 0x294   :  { %v151_v23 = vrot.slane %v150_v22, 2 }
 0x296   :  { %v152_v24 = vadd.f32 %v151_v23, %v150_v22 }
 0x298   :  { %v153_v25 = vrot.slane %v152_v24, 1 }
 0x29a   :  { %v154_v27 = vadd.f32 %v153_v25, %v152_v24 }
 0x29c   :  { %v155_v28 = vadd.f32 %v154_v27, %v24_v26 }
 0x29e   :  { %v157_v29 = vsel %vm156_vm4, %v155_v28, -inf }
 0x29f   :  { %158 = vmax.xlane.f32.xlu0 %v157_v29 }
 0x312   :  { %v159_v30 = vpop.xlane.xlu0 %158 }
 0x313   :  { %v160_v31 = vsub.f32 %v155_v28, %v159_v30 }
 0x315   :  { %v161_v32 = vmul.f32 1.442695, %v160_v31 }
 0x317   :  { %194 = vpow2.f32 %v161_v32 }
 0x31d   :  { %v195_v33 = vpop.eup %194 }
 0x31e   :  { %v163_v34 = vsel %vm156_vm4, %v195_v33, 0.0 }
 0x31f   :  { %164 = vadd.xlane.f32.xlu0 %v163_v34 }
 0x392   :  { %v165_v35 = vpop.xlane.xlu0 %164 }
 0x393   :  { %196 = vlog2.f32 %v165_v35 }
 0x399   :  { %v197_v36 = vpop.eup %196 }
 0x39a   :  { %v167_v37 = vmul.f32 0.6931472, %v197_v36 }
 0x39c   :  { %v168_v38 = vadd.f32 %v167_v37, %v159_v30 }
 0x39e   :  { %v169_v39 = vsub.f32 %v155_v28, %v168_v38 }
 0x3a0   :  { %170 = vst.msk [vmem:[#allocation2] sm:$0x1] %vm156_vm4, %v169_v39 }
 0x3a1   :  { %181 = dma.vmem_to_hbm [thread:$0]  %s177_s2, 16, %s179_s6, [#allocation3]  }
 0x3a2   :  { %222 = dma.done.wait [#allocation3], 16  }
 0x3a3   :  { %223 = vsyncadd [#allocation3], 4294967280 }
 0x3a4   :  { %186 = vsyncpa [#allocation3], 1 }

</bundles_post_ra>
